<compile_context>
chip_gen: v7x
topology: tpu7x:2x2x1
jax: 0.10.0
libtpu: 0.0.40
codegen_flags: <defaults>
</compile_context>

<pallas_src>
import functools

import jax
import jax.numpy as jnp
from jax.experimental import pallas as pl
from jax.experimental.pallas import tpu as pltpu

_LANES = 128
_SUBLANES = 8
_GROUP_ALIGN = 32   # row-group alignment: covers f32(8)/bf16(16)/int8(32) sublane tiles


def _round_up(x, m):
    return (x + m - 1) // m * m


def _choose_tile_s(num_groups, num_classes, itemsize):
    """TILE_S = row-groups (of 128 rows) per grid step.

    ~4 MiB of preds per step, multiple of 32 (int8 label packing), capped so
    there are >= 2 grid tiles whenever the problem is big enough (v7x: 2 TCs).
    """
    target_bytes = 4 << 20
    s = target_bytes // max(1, num_classes * _LANES * itemsize)
    s = max(_GROUP_ALIGN, min(s, 2048))
    s = (s // _GROUP_ALIGN) * _GROUP_ALIGN
    if num_groups >= 2 * _GROUP_ALIGN:
        half = _round_up(num_groups, 2 * _GROUP_ALIGN) // 2
        s = min(s, half)
    s = min(s, _round_up(max(num_groups, 1), _GROUP_ALIGN))
    return max(s, _GROUP_ALIGN)


def _focal_loss_kernel(preds_ref, labels_ref, alpha_ref, out_ref, *,
                       gamma, num_classes):
    # preds_ref : (C, TILE_S, 128)  HBM dtype (bf16 / f32); f32 upcast in-register
    # labels_ref: (TILE_S, 128)     int8 (int32 if C > 127), -1 on padded rows
    # alpha_ref : (C,)              f32 per-class weights in SMEM
    # out_ref   : (1, 8, 128)       f32 lane-dense per-tile partial sum
    C = num_classes
    labels = labels_ref[...].astype(jnp.int32)                   # (S, 128)

    # Pass 1: row-wise max over classes (short unrolled VPU maximum chain).
    # Per-class f32 upcasts are re-read from the VMEM block, never stored.
    m = preds_ref[0].astype(jnp.float32)
    for c in range(1, C):
        m = jnp.maximum(m, preds_ref[c].astype(jnp.float32))

    # Pass 2 (fused): softmax denominator + gathers of z[label], exp(z[label])
    # and alpha[label].  No one-hot / logsoftmax tensor is ever materialized.
    denom = jnp.zeros_like(m)
    z_sel = jnp.zeros_like(m)
    e_sel = jnp.zeros_like(m)
    a_sel = jnp.zeros_like(m)
    for c in range(C):
        zc = preds_ref[c].astype(jnp.float32) - m
        ec = jnp.exp(zc)
        denom = denom + ec
        mc = labels == c
        z_sel = jnp.where(mc, zc, z_sel)
        e_sel = jnp.where(mc, ec, e_sel)
        a_sel = jnp.where(mc, alpha_ref[c], a_sel)

    lse = jnp.log(denom)                     # 1 log (C+1 transcendentals total)
    logp = z_sel - lse                       # log softmax at the label
    p = e_sel / denom                        # softmax prob; reuses the loop's exp
    one_minus_p = jnp.maximum(1.0 - p, 0.0)  # clamp: safe for pow / odd gamma

    # (1 - p) ** gamma: multiply chain for integer gamma (VPU), pow otherwise.
    if isinstance(gamma, int) and gamma >= 0:
        focal = jnp.ones_like(one_minus_p)
        for _ in range(gamma):
            focal = focal * one_minus_p
    else:
        focal = one_minus_p ** gamma

    # Padded / invalid rows (label = -1) have a_sel == 0 -> contribute 0.
    loss = -(a_sel * focal * logp)           # (S, 128)

    partial = jnp.sum(loss)                  # scalar per tile
    out_ref[...] = jnp.full(out_ref.shape, partial, jnp.float32)


def focal_loss(preds, labels, alpha_vec, *, gamma=2, size_average=True,
               tile_s=None):
    """preds: [B, N, C] or [B, C] (any float dtype); labels: [B, N] or [B];
    alpha_vec: [C].  Matches FocalLoss.forward with weight=None."""
    # TODO(synk): optional per-element `weight` multiplier of the reference
    # forward() is not implemented (it defaults to None there).
    C = preds.shape[-1]
    preds2 = preds.reshape(-1, C)                      # (M, C), keep HBM dtype
    M = preds2.shape[0]

    label_dtype = jnp.int8 if C <= 127 else jnp.int32  # 4x less label DMA
    labels1 = labels.reshape(-1).astype(label_dtype)   # (M,)

    num_groups = pl.cdiv(M, _LANES)
    itemsize = jnp.dtype(preds2.dtype).itemsize
    if tile_s is None:
        tile_s = _choose_tile_s(num_groups, C, itemsize)
    g_pad = _round_up(max(num_groups, 1), tile_s)
    m_pad = g_pad * _LANES
    num_tiles = g_pad // tile_s

    # Pad the row axis of (M, C) BEFORE transposing so XLA emits a single
    # relayout copy into the class-major (C, G, 128) slab the kernel reads.
    # (Producing channel-major preds upstream would remove this copy entirely.)
    if m_pad != M:
        preds2 = jnp.pad(preds2, ((0, m_pad - M), (0, 0)))
        labels1 = jnp.pad(labels1, (0, m_pad - M), constant_values=-1)
    preds_t = preds2.T.reshape(C, g_pad, _LANES)       # (C, G, 128)
    labels2 = labels1.reshape(g_pad, _LANES)           # (G, 128)
    alpha1 = alpha_vec.reshape(C).astype(jnp.float32)  # (C,) -> SMEM

    kernel = functools.partial(_focal_loss_kernel, gamma=gamma, num_classes=C)

    partials = pl.pallas_call(
        kernel,
        out_shape=jax.ShapeDtypeStruct((num_tiles, _SUBLANES, _LANES),
                                       jnp.float32),
        grid=(num_tiles,),
        in_specs=[
            pl.BlockSpec((C, tile_s, _LANES), lambda i: (0, i, 0)),
            pl.BlockSpec((tile_s, _LANES), lambda i: (i, 0)),
            pl.BlockSpec(memory_space=pltpu.MemorySpace.SMEM),
        ],
        out_specs=pl.BlockSpec((1, _SUBLANES, _LANES), lambda i: (i, 0, 0)),
        compiler_params=pltpu.CompilerParams(
            dimension_semantics=("parallel",),
            vmem_limit_bytes=48 * 1024 * 1024,   # safe on v7x (64 MiB physical)
        ),
    )(preds_t, labels2, alpha1)

    total = jnp.sum(partials[:, 0, 0])
    if size_average:
        total = total / jnp.float32(M)
    return total


def _reference(preds, labels, alpha_vec, *, gamma=2, size_average=True):
    C = preds.shape[-1]
    p2 = preds.reshape(-1, C).astype(jnp.float32)
    l2 = labels.reshape(-1).astype(jnp.int32)
    logsoft = jax.nn.log_softmax(p2, axis=1)
    logp = jnp.take_along_axis(logsoft, l2[:, None], axis=1)[:, 0]
    p = jnp.exp(logp)
    alpha = alpha_vec[l2]
    loss = -alpha * ((1.0 - p) ** gamma) * logp
    return jnp.mean(loss) if size_average else jnp.sum(loss)


if __name__ == "__main__":
    # FocalLoss(alpha=0.5, gamma=2, num_classes=3, size_average=True)
    alpha_scalar = 0.5
    gamma = 2
    num_classes = 3

    # deterministic parameter setup per __init__: alpha = [a, 1-a, 1-a, ...]
    alpha_vec = jnp.zeros((num_classes,), jnp.float32)
    alpha_vec = alpha_vec.at[0].set(alpha_scalar)
    alpha_vec = alpha_vec.at[1:].set(1.0 - alpha_scalar)

    # detection-style inputs: preds [B, N, C], labels [B, N]
    B, N, C = 2, 8, num_classes
    key = jax.random.PRNGKey(0)
    k1, k2 = jax.random.split(key)
    preds = jax.random.normal(k1, (B, N, C), dtype=jnp.float32)
    labels = jax.random.randint(k2, (B, N), 0, C, dtype=jnp.int32)

    # f32 inputs, size_average=True (mean)
    loss = focal_loss(preds, labels, alpha_vec, gamma=gamma, size_average=True)
    loss = jax.block_until_ready(loss)
    ref = _reference(preds, labels, alpha_vec, gamma=gamma, size_average=True)
    assert jnp.allclose(loss, ref, rtol=1e-5, atol=1e-6), (loss, ref)

    # bf16-in-HBM inputs, size_average=False (sum) — no wrapper upcast.
    preds_bf16 = preds.astype(jnp.bfloat16)
    loss2 = focal_loss(preds_bf16, labels, alpha_vec,
                       gamma=gamma, size_average=False)
    loss2 = jax.block_until_ready(loss2)
    ref2 = _reference(preds_bf16.astype(jnp.float32), labels, alpha_vec,
                      gamma=gamma, size_average=False)
    assert jnp.allclose(loss2, ref2, rtol=1e-3, atol=1e-3), (loss2, ref2)

    print("KERNEL_OK")
</pallas_src>

<mosaic_0001>
module attributes {stable_mosaic.version = 11 : i64} {
  func.func @_focal_loss_kernel(%arg0: i32, %arg1: memref<3x32x128xf32, #tpu.memory_space<vmem>>, %arg2: memref<32x128xi8, #tpu.memory_space<vmem>>, %arg3: memref<3xf32, #tpu.memory_space<smem>>, %arg4: memref<1x8x128xf32, #tpu.memory_space<vmem>>) attributes {dimension_semantics = [#tpu.dimension_semantics<parallel>], iteration_bounds = array<i64: 1>, scalar_prefetch = 0 : i64, scratch_operands = 0 : i64, tpu.core_type = #tpu.core_type<tc>, window_params = [{transform_indices = @transform_0, window_bounds = array<i64: 3, 32, 128>}, {transform_indices = @transform_1, window_bounds = array<i64: 32, 128>}, {transform_indices = @transform_2, window_bounds = array<i64: 3>}, {transform_indices = @transform_3, window_bounds = array<i64: 1, 8, 128>}]} {
    %c0 = arith.constant 0 : index
    %c0_0 = arith.constant 0 : index
    %0 = vector.load %arg2[%c0, %c0_0] : memref<32x128xi8, #tpu.memory_space<vmem>>, vector<32x128xi8>
    %1 = arith.extsi %0 : vector<32x128xi8> to vector<32x128xi32>
    %c0_1 = arith.constant 0 : index
    %c0_2 = arith.constant 0 : index
    %c0_3 = arith.constant 0 : index
    %2 = vector.load %arg1[%c0_1, %c0_2, %c0_3] : memref<3x32x128xf32, #tpu.memory_space<vmem>>, vector<1x32x128xf32>
    %3 = vector.shape_cast %2 : vector<1x32x128xf32> to vector<32x128xf32>
    %c1 = arith.constant 1 : index
    %c0_4 = arith.constant 0 : index
    %c0_5 = arith.constant 0 : index
    %4 = vector.load %arg1[%c1, %c0_4, %c0_5] : memref<3x32x128xf32, #tpu.memory_space<vmem>>, vector<1x32x128xf32>
    %5 = vector.shape_cast %4 : vector<1x32x128xf32> to vector<32x128xf32>
    %6 = arith.maximumf %3, %5 : vector<32x128xf32>
    %c2 = arith.constant 2 : index
    %c0_6 = arith.constant 0 : index
    %c0_7 = arith.constant 0 : index
    %7 = vector.load %arg1[%c2, %c0_6, %c0_7] : memref<3x32x128xf32, #tpu.memory_space<vmem>>, vector<1x32x128xf32>
    %8 = vector.shape_cast %7 : vector<1x32x128xf32> to vector<32x128xf32>
    %9 = arith.maximumf %6, %8 : vector<32x128xf32>
    %cst = arith.constant 0.000000e+00 : f32
    %10 = vector.broadcast %cst : f32 to vector<32x128xf32>
    %cst_8 = arith.constant 0.000000e+00 : f32
    %11 = vector.broadcast %cst_8 : f32 to vector<32x128xf32>
    %cst_9 = arith.constant 0.000000e+00 : f32
    %12 = vector.broadcast %cst_9 : f32 to vector<32x128xf32>
    %cst_10 = arith.constant 0.000000e+00 : f32
    %13 = vector.broadcast %cst_10 : f32 to vector<32x128xf32>
    %c0_11 = arith.constant 0 : index
    %c0_12 = arith.constant 0 : index
    %c0_13 = arith.constant 0 : index
    %14 = vector.load %arg1[%c0_11, %c0_12, %c0_13] : memref<3x32x128xf32, #tpu.memory_space<vmem>>, vector<1x32x128xf32>
    %15 = vector.shape_cast %14 : vector<1x32x128xf32> to vector<32x128xf32>
    %16 = arith.subf %15, %9 : vector<32x128xf32>
    %17 = math.exp %16 : vector<32x128xf32>
    %18 = arith.addf %10, %17 : vector<32x128xf32>
    %c0_i32 = arith.constant 0 : i32
    %19 = vector.broadcast %c0_i32 : i32 to vector<32x128xi32>
    %20 = arith.cmpi eq, %1, %19 : vector<32x128xi32>
    %21 = arith.select %20, %16, %11 : vector<32x128xi1>, vector<32x128xf32>
    %22 = arith.select %20, %17, %12 : vector<32x128xi1>, vector<32x128xf32>
    %c0_14 = arith.constant 0 : index
    %23 = memref.load %arg3[%c0_14] : memref<3xf32, #tpu.memory_space<smem>>
    %24 = vector.broadcast %23 : f32 to vector<32x128xf32>
    %25 = arith.select %20, %24, %13 : vector<32x128xi1>, vector<32x128xf32>
    %c1_15 = arith.constant 1 : index
    %c0_16 = arith.constant 0 : index
    %c0_17 = arith.constant 0 : index
    %26 = vector.load %arg1[%c1_15, %c0_16, %c0_17] : memref<3x32x128xf32, #tpu.memory_space<vmem>>, vector<1x32x128xf32>
    %27 = vector.shape_cast %26 : vector<1x32x128xf32> to vector<32x128xf32>
    %28 = arith.subf %27, %9 : vector<32x128xf32>
    %29 = math.exp %28 : vector<32x128xf32>
    %30 = arith.addf %18, %29 : vector<32x128xf32>
    %c1_i32 = arith.constant 1 : i32
    %31 = vector.broadcast %c1_i32 : i32 to vector<32x128xi32>
    %32 = arith.cmpi eq, %1, %31 : vector<32x128xi32>
    %33 = arith.select %32, %28, %21 : vector<32x128xi1>, vector<32x128xf32>
    %34 = arith.select %32, %29, %22 : vector<32x128xi1>, vector<32x128xf32>
    %c1_18 = arith.constant 1 : index
    %35 = memref.load %arg3[%c1_18] : memref<3xf32, #tpu.memory_space<smem>>
    %36 = vector.broadcast %35 : f32 to vector<32x128xf32>
    %37 = arith.select %32, %36, %25 : vector<32x128xi1>, vector<32x128xf32>
    %c2_19 = arith.constant 2 : index
    %c0_20 = arith.constant 0 : index
    %c0_21 = arith.constant 0 : index
    %38 = vector.load %arg1[%c2_19, %c0_20, %c0_21] : memref<3x32x128xf32, #tpu.memory_space<vmem>>, vector<1x32x128xf32>
    %39 = vector.shape_cast %38 : vector<1x32x128xf32> to vector<32x128xf32>
    %40 = arith.subf %39, %9 : vector<32x128xf32>
    %41 = math.exp %40 : vector<32x128xf32>
    %42 = arith.addf %30, %41 : vector<32x128xf32>
    %c2_i32 = arith.constant 2 : i32
    %43 = vector.broadcast %c2_i32 : i32 to vector<32x128xi32>
    %44 = arith.cmpi eq, %1, %43 : vector<32x128xi32>
    %45 = arith.select %44, %40, %33 : vector<32x128xi1>, vector<32x128xf32>
    %46 = arith.select %44, %41, %34 : vector<32x128xi1>, vector<32x128xf32>
    %c2_22 = arith.constant 2 : index
    %47 = memref.load %arg3[%c2_22] : memref<3xf32, #tpu.memory_space<smem>>
    %48 = vector.broadcast %47 : f32 to vector<32x128xf32>
    %49 = arith.select %44, %48, %37 : vector<32x128xi1>, vector<32x128xf32>
    %50 = math.log %42 : vector<32x128xf32>
    %51 = arith.subf %45, %50 : vector<32x128xf32>
    %52 = arith.divf %46, %42 : vector<32x128xf32>
    %cst_23 = arith.constant 1.000000e+00 : f32
    %53 = vector.broadcast %cst_23 : f32 to vector<32x128xf32>
    %54 = arith.subf %53, %52 : vector<32x128xf32>
    %cst_24 = arith.constant 0.000000e+00 : f32
    %55 = vector.broadcast %cst_24 : f32 to vector<32x128xf32>
    %56 = arith.maximumf %54, %55 : vector<32x128xf32>
    %cst_25 = arith.constant 1.000000e+00 : f32
    %57 = vector.broadcast %cst_25 : f32 to vector<32x128xf32>
    %58 = arith.mulf %57, %56 : vector<32x128xf32>
    %59 = arith.mulf %58, %56 : vector<32x128xf32>
    %60 = arith.mulf %49, %59 : vector<32x128xf32>
    %61 = arith.mulf %60, %51 : vector<32x128xf32>
    %cst_26 = arith.constant 0.000000e+00 : f32
    %62 = vector.broadcast %cst_26 : f32 to vector<32x128xf32>
    %63 = arith.subf %62, %61 : vector<32x128xf32>
    %64 = vector.shape_cast %63 : vector<32x128xf32> to vector<1x32x128xf32>
    %cst_27 = arith.constant dense<0.000000e+00> : vector<1xf32>
    %65 = vector.multi_reduction <add>, %64, %cst_27 [1, 2] : vector<1x32x128xf32> to vector<1xf32>
    %66 = vector.shape_cast %65 : vector<1xf32> to vector<1x1x1xf32>
    %67 = vector.extract %66[0, 0, 0] : f32 from vector<1x1x1xf32>
    %68 = vector.broadcast %67 : f32 to vector<1x8x128xf32>
    %c0_28 = arith.constant 0 : index
    %c0_29 = arith.constant 0 : index
    %c0_30 = arith.constant 0 : index
    %69 = vector.load %arg4[%c0_28, %c0_29, %c0_30] : memref<1x8x128xf32, #tpu.memory_space<vmem>>, vector<1x8x128xf32>
    tpu.vector_store %arg4[%c0_28, %c0_29, %c0_30], %68 {strides = array<i32>} : memref<1x8x128xf32, #tpu.memory_space<vmem>>, vector<1x8x128xf32>,
    return
  }
  func.func @transform_0(%arg0: i32) -> (i32, i32, i32) {
    %c0_i32 = arith.constant 0 : i32
    %c0_i32_0 = arith.constant 0 : i32
    %c0_i32_1 = arith.constant 0 : i32
    return %c0_i32, %arg0, %c0_i32_0 : i32, i32, i32
  }
  func.func @transform_1(%arg0: i32) -> (i32, i32) {
    %c0_i32 = arith.constant 0 : i32
    %c0_i32_0 = arith.constant 0 : i32
    return %arg0, %c0_i32 : i32, i32
  }
  func.func @transform_2(%arg0: i32) -> i32 {
    %c0_i32 = arith.constant 0 : i32
    %c0_i32_0 = arith.constant 0 : i32
    return %c0_i32 : i32
  }
  func.func @transform_3(%arg0: i32) -> (i32, i32, i32) {
    %c0_i32 = arith.constant 0 : i32
    %c0_i32_0 = arith.constant 0 : i32
    %c0_i32_1 = arith.constant 0 : i32
    return %arg0, %c0_i32, %c0_i32_0 : i32, i32, i32
  }
}

</mosaic_0001>

<bundles_post_ra>
// kernel: tpu_custom_call.1
= control target key start
LH: loop header
LB: loop body
LE: loop exit
PB: predicated region body
PF: predicated region fallthrough
CT: control target
= control target key end

     0   :  { %8 = vsyncpa [#allocation3], 0  ;;  %s609_s0 = inlined_call_operand.hbm [shape: f32[3,32,128], index: 0, kind: input, shape index: {}]   ;;  %s610_s1 = inlined_call_operand.hbm [shape: s8[32,128], index: 1, kind: input, shape index: {}]   ;;  %s611_s2 = inlined_call_operand.vmem [shape: f32[3], index: 2, kind: input, shape index: {}]   ;;  %s612_s3 = inlined_call_operand.hbm [shape: f32[1,8,128], index: 3, kind: output, shape index: {}]  }
   0x1   :  { %9 = vsyncpa [#allocation7], 0 }
   0x2   :  { %10 = vsyncpa [#allocation5], 0 }
   0x3   :  { %11 = vsyncpa [#allocation4], 0  ;;  %s394_s12 = smov [#allocation2]   ;;  %s308_s16 = scalar_lea.hbm %s609_s0, 1536 }
   0x4   :  { %s17_s13 = sshll.u32 %s394_s12, 4  ;;  %p309_p0 = scmp.ne.s32.totalorder %s609_s0, %s308_s16  ;;  %s18_s13 = int_to_ptr.vmem [resolvable:$true] %s17_s13 }
   0x5   :  { %p312_p1 = scmp.lt.u32.totalorder %s308_s16, %s609_s0 }
   0x7   :  { %p314_p2 = pnand %p312_p1, %p309_p0 }
   0x9   :  { %317 = shalt.err (!%p314_p2)
}
   0xa   :  { %s318_s21 = scalar_lea.vmem %s18_s13, 1536  ;;  %p323_p4 = scmp.lt.s32.totalorder %s18_s13, %s18_s13 }
   0xb   :  { %p319_p3 = scmp.ne.s32.totalorder %s18_s13, %s318_s21  ;;  %p324_p5 = scmp.lt.s32.totalorder %s318_s21, %s318_s21 }
   0xd   :  { %p325_p6 = por %p324_p5, %p323_p4 }
   0xf   :  { %p326_p7 = pnand %p325_p6, %p319_p3 }
  0x11   :  { %329 = shalt.err (!%p326_p7)
}
  0x12   :  { %s395_s22 = smov 128   ;;  %s396_s23 = smov 8  }
  0x13   :  { %23 = dma.hbm_to_vmem [thread:$0]  %s609_s0, 1536, %s18_s13, [#allocation3], %s395_s22, %s395_s22, %s396_s23  }
  0x14   :  { %s397_s26 = smov [#allocation6]   ;;  %s40_s30 = sshll.u32 %s611_s2, 4  ;;  %s41_s30 = int_to_ptr.vmem [resolvable:$true] %s40_s30 }
  0x15   :  { %s30_s27 = sshll.u32 %s397_s26, 4  ;;  %s330_s6 = scalar_lea.hbm %s610_s1, 128  ;;  %s31_s27 = int_to_ptr.vmem [resolvable:$true] %s30_s27 }
  0x16   :  { %p331_p8 = scmp.ne.s32.totalorder %s610_s1, %s330_s6  ;;  %p334_p9 = scmp.lt.u32.totalorder %s330_s6, %s610_s1 }
  0x18   :  { %p336_p10 = pnand %p334_p9, %p331_p8 }
  0x1a   :  { %339 = shalt.err (!%p336_p10)
}
  0x1b   :  { %s340_s0 = scalar_lea.vmem %s31_s27, 128  ;;  %p345_p12 = scmp.lt.s32.totalorder %s31_s27, %s31_s27 }
  0x1c   :  { %p341_p11 = scmp.ne.s32.totalorder %s31_s27, %s340_s0  ;;  %p346_p13 = scmp.lt.s32.totalorder %s340_s0, %s340_s0 }
  0x1e   :  { %p347_p0 = por %p346_p13, %p345_p12 }
  0x20   :  { %p348_p1 = pnand %p347_p0, %p341_p11 }
  0x22   :  { %351 = shalt.err (!%p348_p1)
}
  0x23   :  { %33 = dma.hbm_to_vmem [thread:$0]  %s610_s1, 128, %s31_s27, [#allocation7]  }
  0x24   :  { %s352_s12 = scalar_lea.vmem %s41_s30, 16  ;;  %p357_p3 = scmp.lt.s32.totalorder %s41_s30, %s41_s30 }
  0x25   :  { %p353_p2 = scmp.ne.s32.totalorder %s41_s30, %s352_s12  ;;  %p358_p4 = scmp.lt.s32.totalorder %s352_s12, %s352_s12 }
  0x27   :  { %p359_p5 = por %p358_p4, %p357_p3 }
  0x29   :  { %p360_p6 = pnand %p359_p5, %p353_p2 }
  0x2b   :  { %363 = shalt.err (!%p360_p6)
}
  0x2c   :  { %s398_s13 = smov [#allocation8]  }
  0x2d   :  { %43 = dma.vmem_to_smem %s41_s30, 16, %s398_s13, [#allocation5]  }
  0x2e   :  { %386 = dma.done.wait [#allocation3], 1536  }
  0x2f   :  { %387 = vsyncadd [#allocation3], 4294965760 }
  0x30   :  { %388 = dma.done.wait [#allocation7], 128  }
  0x31   :  { %389 = vsyncadd [#allocation7], 4294967168 }
  0x32   :  { %390 = dma.done.wait [#allocation5], 16  }
  0x33   :  { %391 = vsyncadd [#allocation5], 4294967280 }
  0x34   :  { %53 = sfence }
  0x35   :  { %v59_v0 = vld [vmem:[#allocation2] sm:$0xff]  ;;  %v60_v1 = vld [vmem:[#allocation2 + $0x8] sm:$0xff]  ;;  %v61_v2 = vld [vmem:[#allocation2 + $0x10] sm:$0xff]  ;;  %s109_s1 = sld [smem:[#allocation8]]  ;;  %s495_s14 = sld [smem:[#allocation8 + $0x1]] }
  0x36   :  { %v62_v3 = vld [vmem:[#allocation2 + $0x18] sm:$0xff]  ;;  %v64_v4 = vld [vmem:[#allocation2 + $0x20] sm:$0xff]  ;;  %v65_v5 = vld [vmem:[#allocation2 + $0x28] sm:$0xff]  ;;  %s522_s15 = sld [smem:[#allocation8 + $0x2]]  ;;  %s399_s16 = smov [#allocation9]  }
  0x37   :  { %v66_v6 = vld [vmem:[#allocation2 + $0x30] sm:$0xff]  ;;  %v67_v7 = vld [vmem:[#allocation2 + $0x38] sm:$0xff]  ;;  %v68_v8 = vmax.f32 %v59_v0, %v64_v4  ;;  %v69_v9 = vmax.f32 %v60_v1, %v65_v5  ;;  %v73_v12 = vld [vmem:[#allocation2 + $0x40] sm:$0xff]  ;;  %s247_s17 = sshll.u32 %s399_s16, 4  ;;  %s248_s17 = int_to_ptr.vmem [resolvable:$true] %s247_s17 }
  0x38   :  { %v70_v10 = vmax.f32 %v61_v2, %v66_v6  ;;  %v71_v11 = vmax.f32 %v62_v3, %v67_v7  ;;  %v74_v13 = vld [vmem:[#allocation2 + $0x48] sm:$0xff]  ;;  %v75_v14 = vld [vmem:[#allocation2 + $0x50] sm:$0xff]  ;;  %v76_v15 = vld [vmem:[#allocation2 + $0x58] sm:$0xff]  ;;  %s364_s19 = scalar_lea.vmem %s248_s17, 128  ;;  %p369_p8 = scmp.lt.s32.totalorder %s248_s17, %s248_s17 }
  0x39   :  { %v77_v16 = vmax.f32 %v68_v8, %v73_v12  ;;  %v78_v17 = vmax.f32 %v69_v9, %v74_v13  ;;  %v54_v54 = vld [vmem:[#allocation6] sm:$0xff]  ;;  %p365_p7 = scmp.ne.s32.totalorder %s248_s17, %s364_s19  ;;  %p370_p9 = scmp.lt.s32.totalorder %s364_s19, %s364_s19 }
  0x3a   :  { %v79_v18 = vmax.f32 %v70_v10, %v75_v14  ;;  %v80_v19 = vmax.f32 %v71_v11, %v76_v15  ;;  %v483_v61 = vunpack.c.0.s8 %v54_v54 }
  0x3b   :  { %v447_v20 = vsub.f32 %v59_v0, %v77_v16  ;;  %v449_v21 = vsub.f32 %v60_v1, %v78_v17  ;;  %v456_v25 = vsub.f32 %v64_v4, %v77_v16  ;;  %v461_v29 = vsub.f32 %v65_v5, %v78_v17  ;;  %p371_p10 = por %p370_p9, %p369_p8 }
  0x3c   :  { %v451_v22 = vsub.f32 %v61_v2, %v79_v18  ;;  %v453_v23 = vsub.f32 %v62_v3, %v80_v19  ;;  %v463_v30 = vsub.f32 %v66_v6, %v79_v18  ;;  %v465_v31 = vsub.f32 %v67_v7, %v80_v19 }
  0x3d   :  { %v85_v24 = vmul.f32 1.442695, %v447_v20  ;;  %v87_v26 = vmul.f32 1.442695, %v449_v21  ;;  %v119_v32 = vmul.f32 1.442695, %v456_v25  ;;  %v471_v36 = vsub.f32 %v73_v12, %v77_v16  ;;  %p372_p11 = pnand %p371_p10, %p365_p7 }
  0x3e   :  { %v89_v27 = vmul.f32 1.442695, %v451_v22  ;;  %v91_v28 = vmul.f32 1.442695, %v453_v23  ;;  %v121_v33 = vmul.f32 1.442695, %v461_v29  ;;  %v473_v37 = vsub.f32 %v74_v13, %v78_v17 }
  0x3f   :  { %268 = vpow2.f32 %v85_v24  ;;  %v123_v34 = vmul.f32 1.442695, %v463_v30  ;;  %v125_v35 = vmul.f32 1.442695, %v465_v31  ;;  %v475_v38 = vsub.f32 %v75_v14, %v79_v18 }
  0x40   :  { %270 = vpow2.f32 %v87_v26  ;;  %v477_v39 = vsub.f32 %v76_v15, %v80_v19  ;;  %v153_v40 = vmul.f32 1.442695, %v471_v36  ;;  %v155_v41 = vmul.f32 1.442695, %v473_v37 }
  0x41   :  { %272 = vpow2.f32 %v89_v27  ;;  %v157_v42 = vmul.f32 1.442695, %v475_v38  ;;  %v487_v0 = vunpack.c.1.s8 %v54_v54  ;;  %v489_v2 = vunpack.c.2.s8 %v54_v54 }
  0x42   :  { %274 = vpow2.f32 %v91_v28  ;;  %v159_v44 = vmul.f32 1.442695, %v477_v39  ;;  %v492_v4 = vunpack.c.3.s8 %v54_v54  ;;  %vm97_vm0 = vcmp.eq.s32.totalorder %v483_v61, 0 }
  0x43   :  { %276 = vpow2.f32 %v119_v32  ;;  %vm98_vm1 = vcmp.eq.s32.totalorder %v487_v0, 0  ;;  %v110_v5 = vstv %s109_s1  ;;  %vm99_vm2 = vcmp.eq.s32.totalorder %v489_v2, 0 }
  0x44   :  { %278 = vpow2.f32 %v121_v33  ;;  %vm100_vm3 = vcmp.eq.s32.totalorder %v492_v4, 0  ;;  %vm131_vm4 = vcmp.eq.s32.totalorder %v483_v61, 1  ;;  %v111_v8 = vsel %vm97_vm0, %v110_v5, 0.0 }
  0x45   :  { %280 = vpow2.f32 %v123_v34  ;;  %vm132_vm5 = vcmp.eq.s32.totalorder %v487_v0, 1  ;;  %v101_v9 = vsel %vm97_vm0, %v447_v20, 0.0  ;;  %v112_v11 = vsel %vm98_vm1, %v110_v5, 0.0 }
  0x46   :  { %282 = vpow2.f32 %v125_v35  ;;  %vm133_vm6 = vcmp.eq.s32.totalorder %v489_v2, 1  ;;  %vm134_vm7 = vcmp.eq.s32.totalorder %v492_v4, 1  ;;  %vm165_vm8 = vcmp.eq.s32.totalorder %v483_v61, 2 }
  0x47   :  { %284 = vpow2.f32 %v153_v40  ;;  %v102_v15 = vsel %vm98_vm1, %v449_v21, 0.0  ;;  %v103_v16 = vsel %vm99_vm2, %v451_v22, 0.0  ;;  %vm166_vm9 = vcmp.eq.s32.totalorder %v487_v0, 2 }
  0x48   :  { %286 = vpow2.f32 %v155_v41  ;;  %v104_v19 = vsel %vm100_vm3, %v453_v23, 0.0  ;;  %v144_v24 = vstv %s495_s14  ;;  %vm167_vm10 = vcmp.eq.s32.totalorder %v489_v2, 2 }
  0x49   :  { %v269_v43 = vpop.eup %268  ;;  %288 = vpow2.f32 %v157_v42  ;;  %v113_v22 = vsel %vm99_vm2, %v110_v5, 0.0  ;;  %vm168_vm11 = vcmp.eq.s32.totalorder %v492_v4, 2  ;;  %v114_v23 = vsel %vm100_vm3, %v110_v5, 0.0 }
  0x4a   :  { %v271_v45 = vpop.eup %270  ;;  %290 = vpow2.f32 %v159_v44  ;;  %v105_v6 = vsel %vm97_vm0, %v269_v43, 0.0  ;;  %v135_v32 = vsel %vm131_vm4, %v456_v25, %v101_v9  ;;  %v136_v33 = vsel %vm132_vm5, %v461_v29, %v102_v15 }
  0x4b   :  { %v273_v46 = vpop.eup %272  ;;  %v106_v7 = vsel %vm98_vm1, %v271_v45, 0.0  ;;  %v137_v40 = vsel %vm133_vm6, %v463_v30, %v103_v16  ;;  %v138_v41 = vsel %vm134_vm7, %v465_v31, %v104_v19  ;;  %v145_v25 = vsel %vm131_vm4, %v144_v24, %v111_v8 }
  0x4c   :  { %v275_v47 = vpop.eup %274  ;;  %v107_v10 = vsel %vm99_vm2, %v273_v46, 0.0  ;;  %v147_v44 = vsel %vm133_vm6, %v144_v24, %v113_v22  ;;  %v148_v31 = vsel %vm134_vm7, %v144_v24, %v114_v23 }
  0x4d   :  { %v277_v48 = vpop.eup %276  ;;  %v108_v12 = vsel %vm100_vm3, %v275_v47, 0.0 }
  0x4e   :  { %v279_v49 = vpop.eup %278  ;;  %v127_v52 = vadd.f32 %v277_v48, %v269_v43  ;;  %v139_v13 = vsel %vm131_vm4, %v277_v48, %v105_v6  ;;  %v146_v43 = vsel %vm132_vm5, %v144_v24, %v112_v11  ;;  %v170_v48 = vsel %vm166_vm9, %v473_v37, %v136_v33 }
  0x4f   :  { %v281_v50 = vpop.eup %280  ;;  %v128_v53 = vadd.f32 %v279_v49, %v271_v45  ;;  %v140_v17 = vsel %vm132_vm5, %v279_v49, %v106_v7 }
  0x50   :  { %v283_v51 = vpop.eup %282  ;;  %v129_v55 = vadd.f32 %v281_v50, %v273_v46  ;;  %v141_v20 = vsel %vm133_vm6, %v281_v50, %v107_v10 }
  0x51   :  { %v285_v56 = vpop.eup %284  ;;  %v130_v57 = vadd.f32 %v283_v51, %v275_v47  ;;  %v142_v26 = vsel %vm134_vm7, %v283_v51, %v108_v12  ;;  %v169_v47 = vsel %vm165_vm8, %v471_v36, %v135_v32  ;;  %v178_v51 = vstv %s522_s15 }
  0x52   :  { %v287_v58 = vpop.eup %286  ;;  %v161_v59 = vadd.f32 %v285_v56, %v127_v52  ;;  %v173_v27 = vsel %vm165_vm8, %v285_v56, %v139_v13  ;;  %v172_v36 = vsel %vm168_vm11, %v477_v39, %v138_v41  ;;  %v180_v5 = vsel %vm166_vm9, %v178_v51, %v146_v43 }
  0x53   :  { %v289_v60 = vpop.eup %288  ;;  %v162_v62 = vadd.f32 %v287_v58, %v128_v53  ;;  %v174_v34 = vsel %vm166_vm9, %v287_v58, %v140_v17  ;;  %v181_v8 = vsel %vm167_vm10, %v178_v51, %v147_v44  ;;  %v182_v11 = vsel %vm168_vm11, %v178_v51, %v148_v31 }
  0x54   :  { %v485_v63 = vpop.eup %290  ;;  %v163_v1 = vadd.f32 %v289_v60, %v129_v55  ;;  %292 = vlog2.f32 %v161_v59  ;;  %v175_v42 = vsel %vm167_vm10, %v289_v60, %v141_v20  ;;  %v171_v55 = vsel %vm167_vm10, %v475_v38, %v137_v40 }
  0x55   :  { %v164_v3 = vadd.f32 %v485_v63, %v130_v57  ;;  %294 = vlog2.f32 %v162_v62  ;;  %v176_v30 = vsel %vm168_vm11, %v485_v63, %v142_v26 }
  0x56   :  { %296 = vlog2.f32 %v163_v1 }
  0x57   :  { %298 = vlog2.f32 %v164_v3 }
  0x58   :  { %300 = vrcp.f32 %v161_v59 }
  0x59   :  { %302 = vrcp.f32 %v162_v62  ;;  %v179_v62 = vsel %vm165_vm8, %v178_v51, %v145_v25 }
  0x5a   :  { %304 = vrcp.f32 %v163_v1 }
  0x5b   :  { %306 = vrcp.f32 %v164_v3 }
  0x5e   :  { %v293_v14 = vpop.eup %292 }
  0x5f   :  { %v295_v18 = vpop.eup %294  ;;  %v184_v52 = vmul.f32 0.6931472, %v293_v14 }
  0x60   :  { %v297_v21 = vpop.eup %296  ;;  %v186_v56 = vmul.f32 0.6931472, %v295_v18 }
  0x61   :  { %v299_v28 = vpop.eup %298  ;;  %v188_v59 = vmul.f32 0.6931472, %v297_v21  ;;  %v191_v38 = vsub.f32 %v169_v47, %v184_v52 }
  0x62   :  { %v301_v35 = vpop.eup %300  ;;  %v190_v63 = vmul.f32 0.6931472, %v299_v28  ;;  %v192_v9 = vsub.f32 %v170_v48, %v186_v56 }
  0x63   :  { %v303_v29 = vpop.eup %302  ;;  %v196_v45 = vmul.f32 %v301_v35, %v173_v27  ;;  %v193_v61 = vsub.f32 %v171_v55, %v188_v59 }
  0x64   :  { %v305_v46 = vpop.eup %304  ;;  %v198_v49 = vmul.f32 %v303_v29, %v174_v34  ;;  %v194_v14 = vsub.f32 %v172_v36, %v190_v63 }
  0x65   :  { %v307_v50 = vpop.eup %306  ;;  %v200_v53 = vmul.f32 %v305_v46, %v175_v42  ;;  %v203_v54 = vsub.f32 1.0, %v196_v45 }
  0x66   :  { %v202_v57 = vmul.f32 %v307_v50, %v176_v30  ;;  %v204_v58 = vsub.f32 1.0, %v198_v49 }
  0x67   :  { %v205_v60 = vsub.f32 1.0, %v200_v53  ;;  %v207_v37 = vmax.f32 %v203_v54, 0.0 }
  0x68   :  { %v206_v1 = vsub.f32 1.0, %v202_v57  ;;  %v208_v3 = vmax.f32 %v204_v58, 0.0 }
  0x69   :  { %v209_v6 = vmax.f32 %v205_v60, 0.0  ;;  %v211_v7 = vmul.f32 %v207_v37, %v207_v37 }
  0x6a   :  { %v210_v39 = vmax.f32 %v206_v1, 0.0  ;;  %v212_v10 = vmul.f32 %v208_v3, %v208_v3 }
  0x6b   :  { %v213_v12 = vmul.f32 %v209_v6, %v209_v6  ;;  %v215_v13 = vmul.f32 %v211_v7, %v179_v62 }
  0x6c   :  { %v214_v15 = vmul.f32 %v210_v39, %v210_v39  ;;  %v216_v16 = vmul.f32 %v212_v10, %v180_v5 }
  0x6d   :  { %v217_v0 = vmul.f32 %v213_v12, %v181_v8  ;;  %v219_v17 = vmul.f32 %v215_v13, %v191_v38 }
  0x6e   :  { %v218_v18 = vmul.f32 %v214_v15, %v182_v11  ;;  %v220_v19 = vmul.f32 %v216_v16, %v192_v9 }
  0x6f   :  { %v221_v20 = vmul.f32 %v217_v0, %v193_v61  ;;  %v223_v24 = vsub.f32 0.0, %v219_v17 }
  0x70   :  { %v222_v2 = vmul.f32 %v218_v18, %v194_v14  ;;  %v224_v21 = vsub.f32 0.0, %v220_v19 }
  0x71   :  { %v225_v22 = vsub.f32 0.0, %v221_v20 }
  0x72   :  { %v226_v26 = vsub.f32 0.0, %v222_v2  ;;  %v227_v27 = vadd.f32 %v224_v21, %v223_v24 }
  0x74   :  { %v228_v28 = vadd.f32 %v227_v27, %v225_v22 }
  0x76   :  { %v229_v4 = vadd.f32 %v228_v28, %v226_v26 }
  0x78   :  { %230 = vadd.xlane.f32.xlu0 %v229_v4 }
 0x105   :  { %v231_v23 = vpop.xlane.xlu0 %230 }
 0x106   :  { %v232_v32 = vrot.slane %v231_v23, 4 }
 0x108   :  { %v233_v33 = vadd.f32 %v232_v32, %v231_v23 }
 0x10a   :  { %v234_v34 = vrot.slane %v233_v33, 2 }
 0x10c   :  { %v235_v35 = vadd.f32 %v234_v34, %v233_v33 }
 0x10e   :  { %v236_v40 = vrot.slane %v235_v35, 1 }
 0x110   :  { %v237_v41 = vadd.f32 %v236_v40, %v235_v35 }
 0x112   :  { %260 = vpush %v237_v41 }
 0x143   :  { %s261_s18 = spop %260 }
 0x144   :  { %v239_v25 = vstv %s261_s18 }
 0x145   :  { %240 = vst [vmem:[#allocation9] sm:$0xff] %v239_v25 }
 0x146   :  { %375 = shalt.err (!%p372_p11)
}
 0x147   :  { %s376_s22 = scalar_lea.hbm %s612_s3, 128 }
 0x148   :  { %p377_p12 = scmp.ne.s32.totalorder %s612_s3, %s376_s22  ;;  %p380_p13 = scmp.lt.u32.totalorder %s376_s22, %s612_s3 }
 0x14a   :  { %p382_p0 = pnand %p380_p13, %p377_p12 }
 0x14c   :  { %385 = shalt.err (!%p382_p0)
}
 0x14d   :  { %250 = dma.vmem_to_hbm [thread:$0]  %s248_s17, 128, %s612_s3, [#allocation4]  }
 0x14e   :  { %392 = dma.done.wait [#allocation4], 128  }
 0x14f   :  { %393 = vsyncadd [#allocation4], 4294967168 }
 0x150   :  { %254 = vsyncpa [#allocation3], 1 }
 0x151   :  { %255 = vsyncpa [#allocation7], 1 }
 0x152   :  { %256 = vsyncpa [#allocation4], 1 }
 0x153   :  { %257 = vsyncpa [#allocation5], 1 }

</bundles_post_ra>
